<compile_context>
chip_gen: v7x
topology: tpu7x:2x2x1
jax: 0.10.0
libtpu: 0.0.40
codegen_flags: <defaults>
</compile_context>

<pallas_src>
import functools

import numpy as np
import jax
import jax.numpy as jnp
from jax.experimental import pallas as pl
from jax.experimental.pallas import tpu as pltpu

_BN_EPS = 1e-5


def _im2col_matmul(win_ref, cols_ref, w_mat, b_col, mask_lo, mask_hi, H, W):
    """One 3x3 SAME conv as a single MXU matmul (channel-major, flat spatial).

    win_ref : (C, M + H*W + M) VMEM window; activation at lane offset M,
              zero halo lanes elsewhere (M = W + 1).
    cols_ref: (9*C, H*W) VMEM scratch for the im2col patch matrix.
    w_mat   : (Cout, 9*C) bf16, K rows ordered (kh, kw, c) to match cols.
    b_col   : (Cout, 1) f32 bias (BN folded in).
    mask_lo : (1, H*W) mask, zero where w == 0      (dw = -1 row bleed).
    mask_hi : (1, H*W) mask, zero where w == W - 1  (dw = +1 row bleed).
    Returns ReLU(w_mat @ cols + b_col) as (Cout, H*W) f32.
    """
    C = win_ref.shape[0]
    HW = H * W
    M = W + 1
    for kh in range(3):
        for kw in range(3):
            t = kh * 3 + kw
            delta = (kh - 1) * W + (kw - 1)      # flat spatial shift of this tap
            start = M + delta                    # static lane offset in the window
            tap = win_ref[:, start:start + HW]   # shifted view; zero halo = SAME pad (h)
            if kw == 0:
                tap = tap * mask_lo
            elif kw == 2:
                tap = tap * mask_hi
            cols_ref[t * C:(t + 1) * C, :] = tap
    cols = cols_ref[...].astype(jnp.bfloat16)    # single cast of the patch matrix
    y = jnp.dot(w_mat, cols, preferred_element_type=jnp.float32)
    return jnp.maximum(y + b_col, 0.0)           # bias + ReLU, f32 epilogue


def _double_conv_kernel(x_ref, m_ref, w1_ref, b1_ref, w2_ref, b2_ref, o_ref,
                        xs_ref, ms_ref, cols1_ref, cols2_ref, *, H, W):
    HW = H * W
    M = W + 1
    Cin = x_ref.shape[0]
    Cmid = w1_ref.shape[0]

    masks = m_ref[...]                            # (2, HW) f32 column masks
    mask_lo32, mask_hi32 = masks[0:1, :], masks[1:2, :]
    masks_bf = masks.astype(jnp.bfloat16)
    mask_lo16, mask_hi16 = masks_bf[0:1, :], masks_bf[1:2, :]

    # Stage the input into its zero-haloed flat window (single interior write;
    # only the halo strips are zeroed, every step -- see header note).
    zc = jnp.zeros((Cin, M), jnp.float32)
    xs_ref[:, 0:M] = zc
    xs_ref[:, M + HW:2 * M + HW] = zc
    xs_ref[:, M:M + HW] = x_ref[...].astype(jnp.float32)

    # conv1 => folded BN1 => ReLU : one K = 9*Cin MXU matmul.
    y1 = _im2col_matmul(xs_ref, cols1_ref, w1_ref[...], b1_ref[...],
                        mask_lo32, mask_hi32, H, W)            # (Cmid, HW) f32

    # Stage conv1's activation in bf16 (halves its VMEM footprint), one write.
    zm = jnp.zeros((Cmid, M), jnp.bfloat16)
    ms_ref[:, 0:M] = zm
    ms_ref[:, M + HW:2 * M + HW] = zm
    ms_ref[:, M:M + HW] = y1.astype(jnp.bfloat16)

    # conv2 => folded BN2 => ReLU : one K = 9*Cmid MXU matmul.
    y2 = _im2col_matmul(ms_ref, cols2_ref, w2_ref[...], b2_ref[...],
                        mask_lo16, mask_hi16, H, W)            # (Cout, HW) f32

    o_ref[...] = y2.astype(o_ref.dtype)           # lane-dense (Cout, H*W) store


def _make_col_masks(H, W):
    """(2, H*W) masks killing the intra-row bleed of the dw = -1 / +1 taps."""
    w_idx = np.tile(np.arange(W), H)
    lo = (w_idx >= 1).astype(np.float32)          # valid positions for dw = -1
    hi = (w_idx <= W - 2).astype(np.float32)      # valid positions for dw = +1
    return np.stack([lo, hi], axis=0)


def double_conv_forward(params, x_nchw):
    """NCHW in / NCHW out forward of (Conv3x3 => BN => ReLU) * 2."""
    N, Cin, H, W = x_nchw.shape
    Cmid = params["w1"].shape[0]
    Cout = params["w2"].shape[0]
    HW = H * W
    M = W + 1

    # Free reshape of contiguous dims + one bf16 cast; no transpose, no pad.
    x = x_nchw.reshape(N, Cin, HW).astype(jnp.bfloat16)
    masks = jnp.asarray(_make_col_masks(H, W))    # (2, HW) f32 constant

    kernel = functools.partial(_double_conv_kernel, H=H, W=W)
    out = pl.pallas_call(
        kernel,
        out_shape=jax.ShapeDtypeStruct((N, Cout, HW), jnp.float32),
        grid=(N,),   # one image per step; N>=2 keeps both v7x TensorCores busy
        in_specs=[
            pl.BlockSpec((None, Cin, HW), lambda n: (n, 0, 0)),
            pl.BlockSpec((2, HW), lambda n: (0, 0)),
            pl.BlockSpec((Cmid, 9 * Cin), lambda n: (0, 0)),
            pl.BlockSpec((Cmid, 1), lambda n: (0, 0)),
            pl.BlockSpec((Cout, 9 * Cmid), lambda n: (0, 0)),
            pl.BlockSpec((Cout, 1), lambda n: (0, 0)),
        ],
        out_specs=pl.BlockSpec((None, Cout, HW), lambda n: (n, 0, 0)),
        scratch_shapes=[
            pltpu.VMEM((Cin, HW + 2 * M), jnp.float32),    # haloed input window
            pltpu.VMEM((Cmid, HW + 2 * M), jnp.bfloat16),  # haloed conv1 activation
            pltpu.VMEM((9 * Cin, HW), jnp.float32),        # conv1 im2col patch matrix
            pltpu.VMEM((9 * Cmid, HW), jnp.bfloat16),      # conv2 im2col patch matrix
        ],
        compiler_params=pltpu.CompilerParams(
            dimension_semantics=("parallel",)),
    )(x, masks, params["w1"], params["b1"], params["w2"], params["b2"])

    return out.reshape(N, Cout, H, W)


# ---------------------------------------------------------------------------
# Deterministic parameter init (PyTorch-style Conv2d init); eval-mode BN folded
# into the conv weights/bias so the kernel epilogue is only bias + ReLU.
# ---------------------------------------------------------------------------
def _init_conv(key, cin, cout):
    kw_, kb_ = jax.random.split(key)
    fan_in = 9 * cin
    bound = 1.0 / np.sqrt(fan_in)
    w = jax.random.uniform(kw_, (3, 3, cin, cout), jnp.float32, -bound, bound)  # HWIO
    b = jax.random.uniform(kb_, (cout,), jnp.float32, -bound, bound)
    return w, b


def init_double_conv(key, in_ch, out_ch):
    k1, k2 = jax.random.split(key)
    w1, b1 = _init_conv(k1, in_ch, out_ch)
    w2, b2 = _init_conv(k2, out_ch, out_ch)
    # Eval-mode BN (running mean=0, var=1, gamma=1, beta=0): fold 1/sqrt(var+eps).
    s = np.float32(1.0 / np.sqrt(1.0 + _BN_EPS))

    def pack_w(w_hwio):
        cin, cout = w_hwio.shape[2], w_hwio.shape[3]
        wk = (w_hwio * s).reshape(9 * cin, cout)       # rows ordered (kh, kw, cin)
        return jnp.transpose(wk).astype(jnp.bfloat16)  # (cout, 9*cin)

    return dict(
        w1=pack_w(w1),
        b1=(b1 * s).reshape(out_ch, 1).astype(jnp.float32),
        w2=pack_w(w2),
        b2=(b2 * s).reshape(out_ch, 1).astype(jnp.float32),
    )


# ---------------------------------------------------------------------------
# Pure-JAX reference (same folded weights) for the correctness check.
# ---------------------------------------------------------------------------
def _double_conv_reference(params, x_nchw):
    def unpack_w(w_mat):
        cout, k9 = w_mat.shape
        cin = k9 // 9
        return jnp.transpose(w_mat.astype(jnp.float32)).reshape(3, 3, cin, cout)

    def conv_bias_relu(h, w_mat, b_col):
        y = jax.lax.conv_general_dilated(
            h, unpack_w(w_mat), window_strides=(1, 1), padding="SAME",
            dimension_numbers=("NCHW", "HWIO", "NCHW"))
        return jnp.maximum(y + b_col.astype(jnp.float32).reshape(1, -1, 1, 1), 0.0)

    y = conv_bias_relu(x_nchw.astype(jnp.float32), params["w1"], params["b1"])
    y = conv_bias_relu(y, params["w2"], params["b2"])
    return y


if __name__ == "__main__":
    key = jax.random.PRNGKey(0)
    pkey, xkey = jax.random.split(key)

    N, C_IN, C_OUT, H, W = 2, 4, 32, 16, 16

    params = init_double_conv(pkey, C_IN, C_OUT)
    x = jax.random.normal(xkey, (N, C_IN, H, W), dtype=jnp.float32)

    fwd = jax.jit(double_conv_forward)
    out = jax.block_until_ready(fwd(params, x))

    assert out.shape == (N, C_OUT, H, W), out.shape
    assert bool(jnp.all(jnp.isfinite(out)))

    ref = _double_conv_reference(params, x)
    max_err = float(jnp.max(jnp.abs(out - ref)))
    # bf16 matmul operands / bf16 input & intermediate, f32 accumulation.
    assert max_err < 5e-2, f"max abs error vs reference: {max_err}"

    print("KERNEL_OK")
</pallas_src>

<mosaic_0001>
module attributes {stable_mosaic.version = 11 : i64} {
  func.func @_double_conv_kernel(%arg0: i32, %arg1: memref<1x4x256xbf16, #tpu.memory_space<vmem>>, %arg2: memref<2x256xf32, #tpu.memory_space<vmem>>, %arg3: memref<32x36xbf16, #tpu.memory_space<vmem>>, %arg4: memref<32x1xf32, #tpu.memory_space<vmem>>, %arg5: memref<32x288xbf16, #tpu.memory_space<vmem>>, %arg6: memref<32x1xf32, #tpu.memory_space<vmem>>, %arg7: memref<1x32x256xf32, #tpu.memory_space<vmem>>, %arg8: memref<4x290xf32, #tpu.memory_space<vmem>>, %arg9: memref<32x290xbf16, #tpu.memory_space<vmem>>, %arg10: memref<36x256xf32, #tpu.memory_space<vmem>>, %arg11: memref<288x256xbf16, #tpu.memory_space<vmem>>) attributes {dimension_semantics = [#tpu.dimension_semantics<parallel>], iteration_bounds = array<i64: 2>, scalar_prefetch = 0 : i64, scratch_operands = 4 : i64, tpu.core_type = #tpu.core_type<tc>, window_params = [{transform_indices = @transform_0, window_bounds = array<i64: 1, 4, 256>}, {pipeline_mode = #tpu.pipeline_mode<synchronous>, transform_indices = @transform_1, window_bounds = array<i64: 2, 256>}, {pipeline_mode = #tpu.pipeline_mode<synchronous>, transform_indices = @transform_2, window_bounds = array<i64: 32, 36>}, {pipeline_mode = #tpu.pipeline_mode<synchronous>, transform_indices = @transform_3, window_bounds = array<i64: 32, 1>}, {pipeline_mode = #tpu.pipeline_mode<synchronous>, transform_indices = @transform_4, window_bounds = array<i64: 32, 288>}, {pipeline_mode = #tpu.pipeline_mode<synchronous>, transform_indices = @transform_5, window_bounds = array<i64: 32, 1>}, {transform_indices = @transform_6, window_bounds = array<i64: 1, 32, 256>}]} {
    %c0 = arith.constant 0 : index
    %c0_0 = arith.constant 0 : index
    %0 = vector.load %arg2[%c0, %c0_0] : memref<2x256xf32, #tpu.memory_space<vmem>>, vector<2x256xf32>
    %1 = vector.extract_strided_slice %0 {offsets = [0, 0], sizes = [1, 256], strides = [1, 1]} : vector<2x256xf32> to vector<1x256xf32>
    %2 = vector.extract_strided_slice %0 {offsets = [1, 0], sizes = [1, 256], strides = [1, 1]} : vector<2x256xf32> to vector<1x256xf32>
    %3 = arith.truncf %0 : vector<2x256xf32> to vector<2x256xbf16>
    %4 = vector.extract_strided_slice %3 {offsets = [0, 0], sizes = [1, 256], strides = [1, 1]} : vector<2x256xbf16> to vector<1x256xbf16>
    %5 = vector.extract_strided_slice %3 {offsets = [1, 0], sizes = [1, 256], strides = [1, 1]} : vector<2x256xbf16> to vector<1x256xbf16>
    %cst = arith.constant 0.000000e+00 : f32
    %6 = vector.broadcast %cst : f32 to vector<4x17xf32>
    %c0_1 = arith.constant 0 : index
    %c0_2 = arith.constant 0 : index
    %7 = vector.load %arg8[%c0_1, %c0_2] : memref<4x290xf32, #tpu.memory_space<vmem>>, vector<4x17xf32>
    tpu.vector_store %arg8[%c0_1, %c0_2], %6 {strides = array<i32>} : memref<4x290xf32, #tpu.memory_space<vmem>>, vector<4x17xf32>,
    %c0_3 = arith.constant 0 : index
    %c273 = arith.constant 273 : index
    %8 = vector.load %arg8[%c0_3, %c273] : memref<4x290xf32, #tpu.memory_space<vmem>>, vector<4x17xf32>
    tpu.vector_store %arg8[%c0_3, %c273], %6 {strides = array<i32>} : memref<4x290xf32, #tpu.memory_space<vmem>>, vector<4x17xf32>,
    %c0_4 = arith.constant 0 : index
    %c0_5 = arith.constant 0 : index
    %c0_6 = arith.constant 0 : index
    %9 = vector.load %arg1[%c0_4, %c0_5, %c0_6] : memref<1x4x256xbf16, #tpu.memory_space<vmem>>, vector<1x4x256xbf16>
    %10 = vector.shape_cast %9 : vector<1x4x256xbf16> to vector<4x256xbf16>
    %11 = arith.extf %10 : vector<4x256xbf16> to vector<4x256xf32>
    %c0_7 = arith.constant 0 : index
    %c17 = arith.constant 17 : index
    %12 = vector.load %arg8[%c0_7, %c17] : memref<4x290xf32, #tpu.memory_space<vmem>>, vector<4x256xf32>
    tpu.vector_store %arg8[%c0_7, %c17], %11 {strides = array<i32>} : memref<4x290xf32, #tpu.memory_space<vmem>>, vector<4x256xf32>,
    %c0_8 = arith.constant 0 : index
    %c0_9 = arith.constant 0 : index
    %13 = vector.load %arg3[%c0_8, %c0_9] : memref<32x36xbf16, #tpu.memory_space<vmem>>, vector<32x36xbf16>
    %c0_10 = arith.constant 0 : index
    %c0_11 = arith.constant 0 : index
    %14 = vector.load %arg4[%c0_10, %c0_11] : memref<32x1xf32, #tpu.memory_space<vmem>>, vector<32x1xf32>
    %c0_12 = arith.constant 0 : index
    %c0_13 = arith.constant 0 : index
    %15 = vector.load %arg8[%c0_12, %c0_13] : memref<4x290xf32, #tpu.memory_space<vmem>>, vector<4x256xf32>
    %16 = vector.broadcast %1 : vector<1x256xf32> to vector<4x256xf32>
    %17 = arith.mulf %15, %16 : vector<4x256xf32>
    %c0_14 = arith.constant 0 : index
    %c0_15 = arith.constant 0 : index
    %18 = vector.load %arg10[%c0_14, %c0_15] : memref<36x256xf32, #tpu.memory_space<vmem>>, vector<4x256xf32>
    tpu.vector_store %arg10[%c0_14, %c0_15], %17 {strides = array<i32>} : memref<36x256xf32, #tpu.memory_space<vmem>>, vector<4x256xf32>,
    %c0_16 = arith.constant 0 : index
    %c1 = arith.constant 1 : index
    %19 = vector.load %arg8[%c0_16, %c1] : memref<4x290xf32, #tpu.memory_space<vmem>>, vector<4x256xf32>
    %c4 = arith.constant 4 : index
    %c0_17 = arith.constant 0 : index
    %20 = vector.load %arg10[%c4, %c0_17] : memref<36x256xf32, #tpu.memory_space<vmem>>, vector<4x256xf32>
    tpu.vector_store %arg10[%c4, %c0_17], %19 {strides = array<i32>} : memref<36x256xf32, #tpu.memory_space<vmem>>, vector<4x256xf32>,
    %c0_18 = arith.constant 0 : index
    %c2 = arith.constant 2 : index
    %21 = vector.load %arg8[%c0_18, %c2] : memref<4x290xf32, #tpu.memory_space<vmem>>, vector<4x256xf32>
    %22 = vector.broadcast %2 : vector<1x256xf32> to vector<4x256xf32>
    %23 = arith.mulf %21, %22 : vector<4x256xf32>
    %c8 = arith.constant 8 : index
    %c0_19 = arith.constant 0 : index
    %24 = vector.load %arg10[%c8, %c0_19] : memref<36x256xf32, #tpu.memory_space<vmem>>, vector<4x256xf32>
    tpu.vector_store %arg10[%c8, %c0_19], %23 {strides = array<i32>} : memref<36x256xf32, #tpu.memory_space<vmem>>, vector<4x256xf32>,
    %c0_20 = arith.constant 0 : index
    %c16 = arith.constant 16 : index
    %25 = vector.load %arg8[%c0_20, %c16] : memref<4x290xf32, #tpu.memory_space<vmem>>, vector<4x256xf32>
    %26 = vector.broadcast %1 : vector<1x256xf32> to vector<4x256xf32>
    %27 = arith.mulf %25, %26 : vector<4x256xf32>
    %c12 = arith.constant 12 : index
    %c0_21 = arith.constant 0 : index
    %28 = vector.load %arg10[%c12, %c0_21] : memref<36x256xf32, #tpu.memory_space<vmem>>, vector<4x256xf32>
    tpu.vector_store %arg10[%c12, %c0_21], %27 {strides = array<i32>} : memref<36x256xf32, #tpu.memory_space<vmem>>, vector<4x256xf32>,
    %c0_22 = arith.constant 0 : index
    %c17_23 = arith.constant 17 : index
    %29 = vector.load %arg8[%c0_22, %c17_23] : memref<4x290xf32, #tpu.memory_space<vmem>>, vector<4x256xf32>
    %c16_24 = arith.constant 16 : index
    %c0_25 = arith.constant 0 : index
    %30 = vector.load %arg10[%c16_24, %c0_25] : memref<36x256xf32, #tpu.memory_space<vmem>>, vector<4x256xf32>
    tpu.vector_store %arg10[%c16_24, %c0_25], %29 {strides = array<i32>} : memref<36x256xf32, #tpu.memory_space<vmem>>, vector<4x256xf32>,
    %c0_26 = arith.constant 0 : index
    %c18 = arith.constant 18 : index
    %31 = vector.load %arg8[%c0_26, %c18] : memref<4x290xf32, #tpu.memory_space<vmem>>, vector<4x256xf32>
    %32 = vector.broadcast %2 : vector<1x256xf32> to vector<4x256xf32>
    %33 = arith.mulf %31, %32 : vector<4x256xf32>
    %c20 = arith.constant 20 : index
    %c0_27 = arith.constant 0 : index
    %34 = vector.load %arg10[%c20, %c0_27] : memref<36x256xf32, #tpu.memory_space<vmem>>, vector<4x256xf32>
    tpu.vector_store %arg10[%c20, %c0_27], %33 {strides = array<i32>} : memref<36x256xf32, #tpu.memory_space<vmem>>, vector<4x256xf32>,
    %c0_28 = arith.constant 0 : index
    %c32 = arith.constant 32 : index
    %35 = vector.load %arg8[%c0_28, %c32] : memref<4x290xf32, #tpu.memory_space<vmem>>, vector<4x256xf32>
    %36 = vector.broadcast %1 : vector<1x256xf32> to vector<4x256xf32>
    %37 = arith.mulf %35, %36 : vector<4x256xf32>
    %c24 = arith.constant 24 : index
    %c0_29 = arith.constant 0 : index
    %38 = vector.load %arg10[%c24, %c0_29] : memref<36x256xf32, #tpu.memory_space<vmem>>, vector<4x256xf32>
    tpu.vector_store %arg10[%c24, %c0_29], %37 {strides = array<i32>} : memref<36x256xf32, #tpu.memory_space<vmem>>, vector<4x256xf32>,
    %c0_30 = arith.constant 0 : index
    %c33 = arith.constant 33 : index
    %39 = vector.load %arg8[%c0_30, %c33] : memref<4x290xf32, #tpu.memory_space<vmem>>, vector<4x256xf32>
    %c28 = arith.constant 28 : index
    %c0_31 = arith.constant 0 : index
    %40 = vector.load %arg10[%c28, %c0_31] : memref<36x256xf32, #tpu.memory_space<vmem>>, vector<4x256xf32>
    tpu.vector_store %arg10[%c28, %c0_31], %39 {strides = array<i32>} : memref<36x256xf32, #tpu.memory_space<vmem>>, vector<4x256xf32>,
    %c0_32 = arith.constant 0 : index
    %c34 = arith.constant 34 : index
    %41 = vector.load %arg8[%c0_32, %c34] : memref<4x290xf32, #tpu.memory_space<vmem>>, vector<4x256xf32>
    %42 = vector.broadcast %2 : vector<1x256xf32> to vector<4x256xf32>
    %43 = arith.mulf %41, %42 : vector<4x256xf32>
    %c32_33 = arith.constant 32 : index
    %c0_34 = arith.constant 0 : index
    %44 = vector.load %arg10[%c32_33, %c0_34] : memref<36x256xf32, #tpu.memory_space<vmem>>, vector<4x256xf32>
    tpu.vector_store %arg10[%c32_33, %c0_34], %43 {strides = array<i32>} : memref<36x256xf32, #tpu.memory_space<vmem>>, vector<4x256xf32>,
    %c0_35 = arith.constant 0 : index
    %c0_36 = arith.constant 0 : index
    %45 = vector.load %arg10[%c0_35, %c0_36] : memref<36x256xf32, #tpu.memory_space<vmem>>, vector<36x256xf32>
    %46 = arith.truncf %45 : vector<36x256xf32> to vector<36x256xbf16>
    %cst_37 = arith.constant dense<0.000000e+00> : vector<32x256xf32>
    %47 = tpu.matmul %13, %46, %cst_37 {dimension_numbers = #tpu.dot_dimension_numbers<[1], [0], [0], [1], [0, 0, 1, 1], [], []>} : vector<32x36xbf16>, vector<36x256xbf16>, vector<32x256xf32> -> vector<32x256xf32>
    %48 = vector.broadcast %14 : vector<32x1xf32> to vector<32x256xf32>
    %49 = arith.addf %47, %48 : vector<32x256xf32>
    %cst_38 = arith.constant 0.000000e+00 : f32
    %50 = vector.broadcast %cst_38 : f32 to vector<32x256xf32>
    %51 = arith.maximumf %49, %50 : vector<32x256xf32>
    %cst_39 = arith.constant 0.000000e+00 : bf16
    %52 = vector.broadcast %cst_39 : bf16 to vector<32x17xbf16>
    %c0_40 = arith.constant 0 : index
    %c0_41 = arith.constant 0 : index
    %53 = vector.load %arg9[%c0_40, %c0_41] : memref<32x290xbf16, #tpu.memory_space<vmem>>, vector<32x17xbf16>
    tpu.vector_store %arg9[%c0_40, %c0_41], %52 {strides = array<i32>} : memref<32x290xbf16, #tpu.memory_space<vmem>>, vector<32x17xbf16>,
    %c0_42 = arith.constant 0 : index
    %c273_43 = arith.constant 273 : index
    %54 = vector.load %arg9[%c0_42, %c273_43] : memref<32x290xbf16, #tpu.memory_space<vmem>>, vector<32x17xbf16>
    tpu.vector_store %arg9[%c0_42, %c273_43], %52 {strides = array<i32>} : memref<32x290xbf16, #tpu.memory_space<vmem>>, vector<32x17xbf16>,
    %55 = arith.truncf %51 : vector<32x256xf32> to vector<32x256xbf16>
    %c0_44 = arith.constant 0 : index
    %c17_45 = arith.constant 17 : index
    %56 = vector.load %arg9[%c0_44, %c17_45] : memref<32x290xbf16, #tpu.memory_space<vmem>>, vector<32x256xbf16>
    tpu.vector_store %arg9[%c0_44, %c17_45], %55 {strides = array<i32>} : memref<32x290xbf16, #tpu.memory_space<vmem>>, vector<32x256xbf16>,
    %c0_46 = arith.constant 0 : index
    %c0_47 = arith.constant 0 : index
    %57 = vector.load %arg5[%c0_46, %c0_47] : memref<32x288xbf16, #tpu.memory_space<vmem>>, vector<32x288xbf16>
    %c0_48 = arith.constant 0 : index
    %c0_49 = arith.constant 0 : index
    %58 = vector.load %arg6[%c0_48, %c0_49] : memref<32x1xf32, #tpu.memory_space<vmem>>, vector<32x1xf32>
    %c0_50 = arith.constant 0 : index
    %c0_51 = arith.constant 0 : index
    %59 = vector.load %arg9[%c0_50, %c0_51] : memref<32x290xbf16, #tpu.memory_space<vmem>>, vector<32x256xbf16>
    %60 = vector.broadcast %4 : vector<1x256xbf16> to vector<32x256xbf16>
    %61 = arith.mulf %59, %60 : vector<32x256xbf16>
    %c0_52 = arith.constant 0 : index
    %c0_53 = arith.constant 0 : index
    %62 = vector.load %arg11[%c0_52, %c0_53] : memref<288x256xbf16, #tpu.memory_space<vmem>>, vector<32x256xbf16>
    tpu.vector_store %arg11[%c0_52, %c0_53], %61 {strides = array<i32>} : memref<288x256xbf16, #tpu.memory_space<vmem>>, vector<32x256xbf16>,
    %c0_54 = arith.constant 0 : index
    %c1_55 = arith.constant 1 : index
    %63 = vector.load %arg9[%c0_54, %c1_55] : memref<32x290xbf16, #tpu.memory_space<vmem>>, vector<32x256xbf16>
    %c32_56 = arith.constant 32 : index
    %c0_57 = arith.constant 0 : index
    %64 = vector.load %arg11[%c32_56, %c0_57] : memref<288x256xbf16, #tpu.memory_space<vmem>>, vector<32x256xbf16>
    tpu.vector_store %arg11[%c32_56, %c0_57], %63 {strides = array<i32>} : memref<288x256xbf16, #tpu.memory_space<vmem>>, vector<32x256xbf16>,
    %c0_58 = arith.constant 0 : index
    %c2_59 = arith.constant 2 : index
    %65 = vector.load %arg9[%c0_58, %c2_59] : memref<32x290xbf16, #tpu.memory_space<vmem>>, vector<32x256xbf16>
    %66 = vector.broadcast %5 : vector<1x256xbf16> to vector<32x256xbf16>
    %67 = arith.mulf %65, %66 : vector<32x256xbf16>
    %c64 = arith.constant 64 : index
    %c0_60 = arith.constant 0 : index
    %68 = vector.load %arg11[%c64, %c0_60] : memref<288x256xbf16, #tpu.memory_space<vmem>>, vector<32x256xbf16>
    tpu.vector_store %arg11[%c64, %c0_60], %67 {strides = array<i32>} : memref<288x256xbf16, #tpu.memory_space<vmem>>, vector<32x256xbf16>,
    %c0_61 = arith.constant 0 : index
    %c16_62 = arith.constant 16 : index
    %69 = vector.load %arg9[%c0_61, %c16_62] : memref<32x290xbf16, #tpu.memory_space<vmem>>, vector<32x256xbf16>
    %70 = vector.broadcast %4 : vector<1x256xbf16> to vector<32x256xbf16>
    %71 = arith.mulf %69, %70 : vector<32x256xbf16>
    %c96 = arith.constant 96 : index
    %c0_63 = arith.constant 0 : index
    %72 = vector.load %arg11[%c96, %c0_63] : memref<288x256xbf16, #tpu.memory_space<vmem>>, vector<32x256xbf16>
    tpu.vector_store %arg11[%c96, %c0_63], %71 {strides = array<i32>} : memref<288x256xbf16, #tpu.memory_space<vmem>>, vector<32x256xbf16>,
    %c0_64 = arith.constant 0 : index
    %c17_65 = arith.constant 17 : index
    %73 = vector.load %arg9[%c0_64, %c17_65] : memref<32x290xbf16, #tpu.memory_space<vmem>>, vector<32x256xbf16>
    %c128 = arith.constant 128 : index
    %c0_66 = arith.constant 0 : index
    %74 = vector.load %arg11[%c128, %c0_66] : memref<288x256xbf16, #tpu.memory_space<vmem>>, vector<32x256xbf16>
    tpu.vector_store %arg11[%c128, %c0_66], %73 {strides = array<i32>} : memref<288x256xbf16, #tpu.memory_space<vmem>>, vector<32x256xbf16>,
    %c0_67 = arith.constant 0 : index
    %c18_68 = arith.constant 18 : index
    %75 = vector.load %arg9[%c0_67, %c18_68] : memref<32x290xbf16, #tpu.memory_space<vmem>>, vector<32x256xbf16>
    %76 = vector.broadcast %5 : vector<1x256xbf16> to vector<32x256xbf16>
    %77 = arith.mulf %75, %76 : vector<32x256xbf16>
    %c160 = arith.constant 160 : index
    %c0_69 = arith.constant 0 : index
    %78 = vector.load %arg11[%c160, %c0_69] : memref<288x256xbf16, #tpu.memory_space<vmem>>, vector<32x256xbf16>
    tpu.vector_store %arg11[%c160, %c0_69], %77 {strides = array<i32>} : memref<288x256xbf16, #tpu.memory_space<vmem>>, vector<32x256xbf16>,
    %c0_70 = arith.constant 0 : index
    %c32_71 = arith.constant 32 : index
    %79 = vector.load %arg9[%c0_70, %c32_71] : memref<32x290xbf16, #tpu.memory_space<vmem>>, vector<32x256xbf16>
    %80 = vector.broadcast %4 : vector<1x256xbf16> to vector<32x256xbf16>
    %81 = arith.mulf %79, %80 : vector<32x256xbf16>
    %c192 = arith.constant 192 : index
    %c0_72 = arith.constant 0 : index
    %82 = vector.load %arg11[%c192, %c0_72] : memref<288x256xbf16, #tpu.memory_space<vmem>>, vector<32x256xbf16>
    tpu.vector_store %arg11[%c192, %c0_72], %81 {strides = array<i32>} : memref<288x256xbf16, #tpu.memory_space<vmem>>, vector<32x256xbf16>,
    %c0_73 = arith.constant 0 : index
    %c33_74 = arith.constant 33 : index
    %83 = vector.load %arg9[%c0_73, %c33_74] : memref<32x290xbf16, #tpu.memory_space<vmem>>, vector<32x256xbf16>
    %c224 = arith.constant 224 : index
    %c0_75 = arith.constant 0 : index
    %84 = vector.load %arg11[%c224, %c0_75] : memref<288x256xbf16, #tpu.memory_space<vmem>>, vector<32x256xbf16>
    tpu.vector_store %arg11[%c224, %c0_75], %83 {strides = array<i32>} : memref<288x256xbf16, #tpu.memory_space<vmem>>, vector<32x256xbf16>,
    %c0_76 = arith.constant 0 : index
    %c34_77 = arith.constant 34 : index
    %85 = vector.load %arg9[%c0_76, %c34_77] : memref<32x290xbf16, #tpu.memory_space<vmem>>, vector<32x256xbf16>
    %86 = vector.broadcast %5 : vector<1x256xbf16> to vector<32x256xbf16>
    %87 = arith.mulf %85, %86 : vector<32x256xbf16>
    %c256 = arith.constant 256 : index
    %c0_78 = arith.constant 0 : index
    %88 = vector.load %arg11[%c256, %c0_78] : memref<288x256xbf16, #tpu.memory_space<vmem>>, vector<32x256xbf16>
    tpu.vector_store %arg11[%c256, %c0_78], %87 {strides = array<i32>} : memref<288x256xbf16, #tpu.memory_space<vmem>>, vector<32x256xbf16>,
    %c0_79 = arith.constant 0 : index
    %c0_80 = arith.constant 0 : index
    %89 = vector.load %arg11[%c0_79, %c0_80] : memref<288x256xbf16, #tpu.memory_space<vmem>>, vector<288x256xbf16>
    %cst_81 = arith.constant dense<0.000000e+00> : vector<32x256xf32>
    %90 = tpu.matmul %57, %89, %cst_81 {dimension_numbers = #tpu.dot_dimension_numbers<[1], [0], [0], [1], [0, 0, 1, 1], [], []>} : vector<32x288xbf16>, vector<288x256xbf16>, vector<32x256xf32> -> vector<32x256xf32>
    %91 = vector.broadcast %58 : vector<32x1xf32> to vector<32x256xf32>
    %92 = arith.addf %90, %91 : vector<32x256xf32>
    %cst_82 = arith.constant 0.000000e+00 : f32
    %93 = vector.broadcast %cst_82 : f32 to vector<32x256xf32>
    %94 = arith.maximumf %92, %93 : vector<32x256xf32>
    %c0_83 = arith.constant 0 : index
    %c0_84 = arith.constant 0 : index
    %c0_85 = arith.constant 0 : index
    %95 = vector.load %arg7[%c0_83, %c0_84, %c0_85] : memref<1x32x256xf32, #tpu.memory_space<vmem>>, vector<1x32x256xf32>
    %96 = vector.shape_cast %95 : vector<1x32x256xf32> to vector<32x256xf32>
    %97 = vector.shape_cast %94 : vector<32x256xf32> to vector<1x32x256xf32>
    tpu.vector_store %arg7[%c0_83, %c0_84, %c0_85], %97 {strides = array<i32>} : memref<1x32x256xf32, #tpu.memory_space<vmem>>, vector<1x32x256xf32>,
    return
  }
  func.func @transform_0(%arg0: i32) -> (i32, i32, i32) {
    %c0_i32 = arith.constant 0 : i32
    %c0_i32_0 = arith.constant 0 : i32
    %c0_i32_1 = arith.constant 0 : i32
    return %arg0, %c0_i32, %c0_i32_0 : i32, i32, i32
  }
  func.func @transform_1(%arg0: i32) -> (i32, i32) {
    %c0_i32 = arith.constant 0 : i32
    %c0_i32_0 = arith.constant 0 : i32
    %c0_i32_1 = arith.constant 0 : i32
    return %c0_i32, %c0_i32_0 : i32, i32
  }
  func.func @transform_2(%arg0: i32) -> (i32, i32) {
    %c0_i32 = arith.constant 0 : i32
    %c0_i32_0 = arith.constant 0 : i32
    %c0_i32_1 = arith.constant 0 : i32
    return %c0_i32, %c0_i32_0 : i32, i32
  }
  func.func @transform_3(%arg0: i32) -> (i32, i32) {
    %c0_i32 = arith.constant 0 : i32
    %c0_i32_0 = arith.constant 0 : i32
    %c0_i32_1 = arith.constant 0 : i32
    return %c0_i32, %c0_i32_0 : i32, i32
  }
  func.func @transform_4(%arg0: i32) -> (i32, i32) {
    %c0_i32 = arith.constant 0 : i32
    %c0_i32_0 = arith.constant 0 : i32
    %c0_i32_1 = arith.constant 0 : i32
    return %c0_i32, %c0_i32_0 : i32, i32
  }
  func.func @transform_5(%arg0: i32) -> (i32, i32) {
    %c0_i32 = arith.constant 0 : i32
    %c0_i32_0 = arith.constant 0 : i32
    %c0_i32_1 = arith.constant 0 : i32
    return %c0_i32, %c0_i32_0 : i32, i32
  }
  func.func @transform_6(%arg0: i32) -> (i32, i32, i32) {
    %c0_i32 = arith.constant 0 : i32
    %c0_i32_0 = arith.constant 0 : i32
    %c0_i32_1 = arith.constant 0 : i32
    return %arg0, %c0_i32, %c0_i32_0 : i32, i32, i32
  }
}

</mosaic_0001>

<bundles_post_ra>
// kernel: double_conv_forward.1
= control target key start
LH: loop header
LB: loop body
LE: loop exit
PB: predicated region body
PF: predicated region fallthrough
CT: control target
= control target key end

     0   :  { %s1534_s21 = smov 0   ;;  %s1883_s0 = inlined_call_operand.vmem [shape: bf16[2,4,256], index: 0, kind: input, shape index: {}]   ;;  %s1884_s1 = inlined_call_operand.vmem [shape: f32[2,256], index: 1, kind: input, shape index: {}]   ;;  %s1885_s2 = inlined_call_operand.vmem [shape: bf16[32,36], index: 2, kind: input, shape index: {}]   ;;  %s1886_s3 = inlined_call_operand.vmem [shape: f32[32,1], index: 3, kind: input, shape index: {}]   ;;  %s1887_s4 = inlined_call_operand.vmem [shape: bf16[32,288], index: 4, kind: input, shape index: {}]   ;;  %s1888_s5 = inlined_call_operand.vmem [shape: f32[32,1], index: 5, kind: input, shape index: {}]   ;;  %s1889_s6 = inlined_call_operand.vmem [shape: f32[2,32,256], index: 6, kind: output, shape index: {}]  }
   0x1 LB: > { %s1391_s22 = sadd.s32 4294967295, %s1480_s21   ;;  %p1395_p0 = scmp.ge.s32.totalorder %s1480_s21, 1  ;;  %s1480_s21 = sphi %s1534_s21, %s16_s21  }
   0x2   : > { %p212_p1 = scmp.lt.s32.totalorder %s1480_s21, 3 }
   0x4   : > { %p213_p2 = pnand %p1395_p0, %p212_p1 }
   0x5   : > { %p242_p3 = scmp.lt.s32.totalorder (!%p213_p2), %s1391_s22, 1  ;;  %v258_v0 = vlaneseq (!%p213_p2)  ;;  %vm267_vm0 = vcmask (!%p213_p2), 134144   ;;  %v1482_v1 = vmov (!%p213_p2), 0.0   ;;  %vm269_vm1 = vcmask (!%p213_p2), 273544   ;;  %v1550_v3 = vld [vmem:[%s1884_s1] sm:$0xf] (!%p213_p2) }
   0x6   : > { %216 = sbr.rel (%p213_p2) target bundleno = 1102 (0x44e), region = 44  ;;  %268 = vst.msk [vmem:[#allocation2] sm:$0xf] (!%p213_p2), %vm267_vm0, %v1482_v1  ;;  %s1483_s29 = smov (!%p213_p2), 17   ;;  %vm281_vm2 = vcmask (!%p213_p2), 1043592   ;;  %vm282_vm3 = vcmask (!%p213_p2), 1047556  }
   0x7   : > { %v1545_v2 = vshrl.u32 (!%p213_p2), %v258_v0, 7  ;;  %270 = vst.msk [vmem:[#allocation2 + $0x8] sm:$0xf] (!%p213_p2), %vm269_vm1, %v1482_v1  ;;  %s1484_s30 = smov (!%p213_p2), 16   ;;  %s1485_s7 = smov (!%p213_p2), 2   ;;  %vm277_vm4 = vcmask (!%p213_p2), 138240   ;;  %vm283_vm5 = vmor (!%p213_p2), %vm282_vm3, %vm281_vm2 }
   0x8   : > { %s1486_s8 = smov (!%p213_p2), 32   ;;  %s1487_s9 = smov (!%p213_p2), 18   ;;  %vm395_vm6 = vcmask (!%p213_p2), 130048   ;;  %vm368_vm7 = vcmask (!%p213_p2), 15360   ;;  %vm441_vm8 = vcmask (!%p213_p2), 146432   ;;  %vm469_vm9 = vcmask (!%p213_p2), 261120  }
   0x9   : > { %v1554_v4 = vsub.s32 (!%p213_p2), 0, %v1545_v2  ;;  %v301_v5 = vsub.s32 (!%p213_p2), 2, %v1545_v2  ;;  %v346_v6 = vsub.s32 (!%p213_p2), 1, %v1545_v2  ;;  %v350_v7 = vsub.s32 (!%p213_p2), 3, %v1545_v2  ;;  %s1488_s10 = smov (!%p213_p2), 34   ;;  %s1489_s11 = smov (!%p213_p2), 111  }
   0xa   : > { %s1490_s12 = smov (!%p213_p2), 95   ;;  %s1491_s13 = smov (!%p213_p2), 127   ;;  %vm515_vm10 = vcmask (!%p213_p2), 277504   ;;  %vm335_vm11 = vcmask (!%p213_p2), 1039360   ;;  %vm503_vm12 = vcmask (!%p213_p2), 777216   ;;  %vm429_vm13 = vcmask (!%p213_p2), 908288  }
   0xb   : > { %v298_v9 = vrot.slane (!%p213_p2), %v1550_v3, %v1554_v4  ;;  %v302_v10 = vrot.slane (!%p213_p2), %v1550_v3, %v301_v5  ;;  %v347_v11 = vrot.slane (!%p213_p2), %v1550_v3, %v346_v6  ;;  %v351_v12 = vrot.slane (!%p213_p2), %v1550_v3, %v350_v7  ;;  %s1492_s14 = smov (!%p213_p2), 96   ;;  %s1493_s15 = smov (!%p213_p2), 126  }
   0xc   : > { %s1494_s16 = smov (!%p213_p2), 112   ;;  %s1495_s17 = smov (!%p213_p2), 110   ;;  %v1497_v7 = vmov (!%p213_p2), 0   ;;  %vm457_vm14 = vcmask (!%p213_p2), 900096   ;;  %vm383_vm15 = vcmask (!%p213_p2), 1031168   ;;  %vm484_vm1 = vcmask (!%p213_p2), 785408  }
   0xd   : > { %s1891_s22 = smov (!%p242_p3, %s1391_s22), 1  ;;  %v308_v14 = vrot.slane %v298_v9, %v1554_v4  ;;  %v312_v15 = vrot.slane %v302_v10, %v1554_v4  ;;  %v357_v16 = vrot.slane %v347_v11, %v346_v6  ;;  %v361_v17 = vrot.slane %v351_v12, %v346_v6  ;;  %s1496_s18 = smov 94   ;;  %658 = vst.msk [vmem:[#allocation3] sm:$0xff] %vm277_vm4, %v1497_v7  ;;  %v290_v9 = vld [vmem:[%s1886_s3] sm:$0xff]  ;;  %v292_v10 = vld [vmem:[%s1886_s3 + $0x10] sm:$0xff]  ;;  %v293_v11 = vld [vmem:[%s1886_s3 + $0x18] sm:$0xff] }
   0xe   : > { %s1415_s25 = sshll.u32 %s1891_s22, 2  ;;  %659 = vst.msk [vmem:[#allocation3 + $0x18] sm:$0xff] %vm277_vm4, %v1497_v7  ;;  %629 = vmatprep.mubr.bf16.mxu0 %v1497_v7  ;;  %1459 = vset.pattern.permute.xlu1 %v1497_v7  ;;  %vm530_vm2 = vcmask 769024   ;;  %vm590_vm3 = vcmask 1041408   ;;  %s1416_s23 = sshll.u32 %s1891_s22, 6 }
   0xf   : > { %s246_s28 = scalar_lea.vmem %s1883_s0, %s1415_s25  ;;  %v315_v18 = vcombine.low %v308_v14, %v312_v15  ;;  %v364_v19 = vcombine.low %v357_v16, %v361_v17  ;;  %1458 = vset.pattern.permute.xlu0 %v1497_v7 }
  0x10   : > { %v271_v8 = vld [vmem:[%s246_s28] sm:$0xf] }
  0x11   : > { %v272_v13 = vunpack.c.l.bf16 %v271_v8  ;;  %392 = vrot.lane.b32.xlu1 %v315_v18, %s1484_s30  ;;  %v291_v8 = vld [vmem:[%s1886_s3 + $0x8] sm:$0xff] }
  0x13   : > { %274 = vrot.lane.b32.xlu0 %v272_v13, %s1483_s29 }
  0x15   : > { %466 = vrot.lane.b32.xlu1 %v315_v18, %s1486_s8 }
  0x17   : > { %365 = vrot.lane.b32.xlu0 %v364_v19, %s1485_s7 }
  0x19   : > { %512 = vrot.lane.b32.xlu1 %v364_v19, %s1488_s10 }
  0x1b   : > { %438 = vrot.lane.b32.xlu0 %v364_v19, %s1487_s9 }
  0x83   : > { %v1577_v23 = vpop.permute.xlu1 %392 }
  0x84   : > { %v394_v35 = vrot.slane %v1577_v23, 4 }
  0x85   : > { %v275_v20 = vpop.permute.xlu0 %274 }
  0x86   : > { %v276_v21 = vrot.slane %v275_v20, 4  ;;  %v396_v39 = vsel %vm395_vm6, %v394_v35, %v1577_v23 }
  0x87   : > { %v467_v25 = vpop.permute.xlu1 %466 }
  0x88   : > { %v278_v22 = vsel %vm277_vm4, %v276_v21, %v275_v20  ;;  %285 = vst.msk [vmem:[#allocation2 + $0x8] sm:$0xf] %vm267_vm0, %v276_v21  ;;  %v468_v27 = vrot.slane %v467_v25, 4  ;;  %vm411_vm0 = vcmask 916480  }
  0x89   : > { %284 = vst.msk [vmem:[#allocation2] sm:$0xff] %vm283_vm5, %v278_v22  ;;  %v366_v30 = vpop.permute.xlu0 %365  ;;  %vm583_vm5 = vcmask 293888  }
  0x8a   : > { %v367_v31 = vrot.slane %v366_v30, 4  ;;  %v470_v52 = vsel %vm469_vm9, %v468_v27, %v467_v25 }
  0x8b   : > { %v513_v49 = vpop.permute.xlu1 %512 }
  0x8c   : > { %v369_v40 = vsel %vm368_vm7, %v367_v31, %v366_v30  ;;  %v514_v53 = vrot.slane %v513_v49, 4 }
  0x8d   : > { %v439_v41 = vpop.permute.xlu0 %438 }
  0x8e   : > { %v440_v44 = vrot.slane %v439_v41, 4  ;;  %v516_v56 = vsel %vm515_vm10, %v514_v53, %v513_v49 }
  0x8f   : > { %v419_v26 = vld [vmem:[#allocation2 + $0x8] sm:$0xf] }
  0x90   : > { %v1579_v24 = vld [vmem:[#allocation2] sm:$0xff]  ;;  %427 = vrot.lane.b32.xlu0 %v419_v26, %s1489_s11  ;;  %v465_v28 = vld [vmem:[#allocation2 + $0x8] sm:$0xf]  ;;  %v442_v48 = vsel %vm441_vm8, %v440_v44, %v439_v41 }
  0x91   : > { %499 = vrot.lane.b32.xlu1 %v1579_v24, %s1490_s12  ;;  %v317_v29 = vmul.f32 %v1579_v24, %v315_v18  ;;  %v474_v32 = vmul.f32 %v468_v27, %v465_v28  ;;  %v1462_v33 = vld [vmem:[#allocation2 + $0x8] ss:$0 sps:$4 sm:$0xff]   ;;  %v372_v42 = vmul.f32 %v369_v40, %v1579_v24  ;;  %v399_v43 = vmul.f32 %v396_v39, %v1579_v24 }
  0x92   : > { %v343_v36 = vld [vmem:[#allocation2 + $0x8] sm:$0xf]  ;;  %v495_v45 = vcombine.low %v1579_v24, %v1579_v24  ;;  %v422_v46 = vcombine.high %v1579_v24, %v1579_v24  ;;  %v445_v50 = vmul.f32 %v442_v48, %v1579_v24  ;;  %v473_v54 = vmul.f32 %v470_v52, %v1579_v24 }
  0x93   : > { %v319_v34 = vcombine.high %v317_v29, %v317_v29  ;;  %321 = vst [vmem:[#allocation4] sm:$0xf] %v317_v29  ;;  %v373_v37 = vmul.f32 %v367_v31, %v343_v36  ;;  %v1463_v38 = vld [vmem:[#allocation2 + $0x8] ss:$0 sps:$4 sm:$0xff]   ;;  %v519_v58 = vmul.f32 %v516_v56, %v1579_v24  ;;  %v376_v59 = vcombine.high %v372_v42, %v372_v42 }
  0x94   : > { %331 = vrot.lane.b32.xlu0 %v1579_v24, %s1491_s13  ;;  %v437_v47 = vld [vmem:[#allocation2 + $0x8] sm:$0xf]  ;;  %v403_v61 = vcombine.low %v399_v43, %v399_v43  ;;  %v449_v63 = vcombine.low %v445_v50, %v445_v50  ;;  %v477_v0 = vcombine.high %v473_v54, %v473_v54 }
  0x95   : > { %423 = vrot.lane.b32.xlu1 %v1579_v24, %s1489_s11  ;;  %322 = vst [vmem:[#allocation4 + $0x8] sm:$0xf] %v319_v34  ;;  %v446_v51 = vmul.f32 %v440_v44, %v437_v47  ;;  %v391_v57 = vld [vmem:[#allocation2 + $0x8] sm:$0xf]  ;;  %v523_v6 = vcombine.high %v519_v58, %v519_v58 }
  0x96   : > { %v400_v60 = vmul.f32 %v394_v35, %v391_v57  ;;  %v511_v1 = vld [vmem:[#allocation2 + $0x8] sm:$0xf] }
  0x97   : > { %v450_v55 = vcombine.low %v446_v51, %v446_v51  ;;  %v520_v5 = vmul.f32 %v514_v53, %v511_v1 }
  0x98   : > { %482 = vrot.lane.b32.xlu0 %v474_v32, %s1492_s14  ;;  %v404_v62 = vcombine.low %v400_v60, %v400_v60 }
  0x99   : > { %333 = vrot.lane.b32.xlu1 %v1462_v33, %s1491_s13 }
  0x9c   : > { %501 = vrot.lane.b32.xlu0 %v1463_v38, %s1490_s12 }
  0x9d   : > { %381 = vrot.lane.b32.xlu1 %v373_v37, %s1493_s15 }
  0xa0   : > { %407 = vrot.lane.b32.xlu0 %v399_v43, %s1494_s16 }
  0xa1   : > { %377 = vrot.lane.b32.xlu1 %v372_v42, %s1493_s15 }
  0xa4   : > { %329 = vrot.lane.b32.xlu0 %v495_v45, %s1491_s13 }
  0xa5   : > { %425 = vrot.lane.b32.xlu1 %v422_v46, %s1489_s11 }
  0xa8   : > { %497 = vrot.lane.b32.xlu0 %v495_v45, %s1490_s12 }
  0xa9   : > { %453 = vrot.lane.b32.xlu1 %v445_v50, %s1495_s17 }
  0xac   : > { %455 = vrot.lane.b32.xlu0 %v450_v55, %s1495_s17 }
  0xad   : > { %478 = vrot.lane.b32.xlu1 %v473_v54, %s1492_s14 }
  0xb0   : > { %379 = vrot.lane.b32.xlu0 %v376_v59, %s1493_s15 }
  0xb1   : > { %524 = vrot.lane.b32.xlu1 %v519_v58, %s1496_s18 }
  0xb4   : > { %405 = vrot.lane.b32.xlu0 %v403_v61, %s1494_s16 }
  0xb5   : > { %409 = vrot.lane.b32.xlu1 %v404_v62, %s1494_s16 }
  0xb8   : > { %451 = vrot.lane.b32.xlu0 %v449_v63, %s1495_s17 }
  0xb9   : > { %480 = vrot.lane.b32.xlu1 %v477_v0, %s1492_s14 }
  0xbc   : > { %526 = vrot.lane.b32.xlu0 %v523_v6, %s1496_s18 }
  0xbd   : > { %528 = vrot.lane.b32.xlu1 %v520_v5, %s1496_s18 }
  0xc0   : > { %555 = vperm.xlu0 %1458, %v290_v9   ;;  %v1464_v9 = vld [vmem:[%s1885_s2] sm:$0xff]  }
  0xc1   : > { %560 = vperm.xlu1 %1459, %v291_v8  }
  0xc4   : > { %570 = vperm.xlu0 %1458, %v293_v11   ;;  %v1498_v11 = vmov 1983009808  }
  0xc5   : > { %565 = vperm.xlu1 %1459, %v292_v10   ;;  %v1465_v10 = vld [vmem:[%s1885_s2 + $0x8] sm:$0xff]  }
 0x102   : > { %v428_v12 = vpop.permute.xlu0 %427 }
 0x103   : > { %v500_v13 = vpop.permute.xlu1 %499 }
 0x106   : > { %v332_v14 = vpop.permute.xlu0 %331 }
 0x107   : > { %v424_v15 = vpop.permute.xlu1 %423 }
 0x10a   : > { %v483_v16 = vpop.permute.xlu0 %482 }
 0x10b   : > { %v334_v17 = vpop.permute.xlu1 %333 }
 0x10c   : > { %v337_v18 = vsel %vm335_vm11, %v332_v14, %v334_v17 }
 0x10d   : > { %341 = vst [vmem:[#allocation4 + $0x8] sm:$0xf0] %v337_v18 }
 0x10e   : > { %v502_v19 = vpop.permute.xlu0 %501 }
 0x10f   : > { %v382_v20 = vpop.permute.xlu1 %381  ;;  %v505_v21 = vsel %vm503_vm12, %v500_v13, %v502_v19 }
 0x110   : > { %509 = vst [vmem:[#allocation4 + $0x38] sm:$0xf0] %v505_v21 }
 0x112   : > { %v408_v22 = vpop.permute.xlu0 %407 }
 0x113   : > { %v378_v23 = vpop.permute.xlu1 %377 }
 0x114   : > { %v538_v52 = vld [vmem:[#allocation4 + $0x8] sm:$0xff] }
 0x116   : > { %v330_v24 = vpop.permute.xlu0 %329 }
 0x117   : > { %v426_v25 = vpop.permute.xlu1 %425  ;;  %v336_v26 = vsel %vm335_vm11, %v330_v24, %v332_v14 }
 0x118   : > { %v430_v27 = vsel %vm429_vm13, %v424_v15, %v426_v25  ;;  %v431_v28 = vsel %vm429_vm13, %v426_v25, %v428_v12  ;;  %340 = vst [vmem:[#allocation4] sm:$0xf0] %v336_v26  ;;  %v256_v12 = vunpack.c.l.s4 %v1498_v11 }
 0x119   : > { %434 = vst [vmem:[#allocation4 + $0x20] sm:$0xf] %v430_v27  ;;  %435 = vst [vmem:[#allocation4 + $0x28] sm:$0xf] %v431_v28 }
 0x11a   : > { %v498_v29 = vpop.permute.xlu0 %497 }
 0x11b   : > { %v454_v30 = vpop.permute.xlu1 %453  ;;  %v504_v31 = vsel %vm503_vm12, %v498_v29, %v500_v13  ;;  %v257_v13 = vunpack.c.0.s8 %v256_v12 }
 0x11c   : > { %508 = vst [vmem:[#allocation4 + $0x30] sm:$0xf0] %v504_v31 }
 0x11d   : > { %v260_v14 = vsub.s32 %v257_v13, %v1545_v2 }
 0x11e   : > { %v456_v32 = vpop.permute.xlu0 %455 }
 0x11f   : > { %v479_v33 = vpop.permute.xlu1 %478  ;;  %v459_v34 = vsel %vm457_vm14, %v454_v30, %v456_v32  ;;  %v537_v56 = vld [vmem:[#allocation4] sm:$0xff]  ;;  %v261_v15 = vrot.slane %v1550_v3, %v260_v14 }
 0x120   : > { %463 = vst [vmem:[#allocation4 + $0x28] sm:$0xf0] %v459_v34 }
 0x121   : > { %v265_v28 = vpack.c.bf16 %v261_v15, %v261_v15 }
 0x122   : > { %v380_v35 = vpop.permute.xlu0 %379 }
 0x123   : > { %v525_v36 = vpop.permute.xlu1 %524  ;;  %v384_v37 = vsel %vm383_vm15, %v378_v23, %v380_v35  ;;  %v385_v38 = vsel %vm383_vm15, %v380_v35, %v382_v20  ;;  %v262_v23 = vcombine.high %v261_v15, %v261_v15 }
 0x124   : > { %388 = vst [vmem:[#allocation4 + $0x10] sm:$0xf] %v384_v37  ;;  %389 = vst [vmem:[#allocation4 + $0x18] sm:$0xf] %v385_v38  ;;  %v776_v37 = vshrl.u32 %v265_v28, 16 }
 0x125   : > { %v266_v31 = vpack.c.bf16 %v262_v23, %v262_v23 }
 0x126   : > { %v406_v39 = vpop.permute.xlu0 %405 }
 0x127   : > { %v410_v40 = vpop.permute.xlu1 %409  ;;  %v412_v41 = vsel %vm411_vm0, %v406_v39, %v408_v22  ;;  %v542_v58 = vld [vmem:[#allocation4 + $0x28] sm:$0xff] }
 0x128   : > { %v413_v42 = vsel %vm411_vm0, %v408_v22, %v410_v40  ;;  %416 = vst [vmem:[#allocation4 + $0x10] sm:$0xf0] %v412_v41  ;;  %v783_v41 = vshrl.u32 %v266_v31, 16 }
 0x129   : > { %417 = vst [vmem:[#allocation4 + $0x18] sm:$0xf0] %v413_v42 }
 0x12a   : > { %v452_v43 = vpop.permute.xlu0 %451 }
 0x12b   : > { %v481_v44 = vpop.permute.xlu1 %480  ;;  %v458_v45 = vsel %vm457_vm14, %v452_v43, %v454_v30 }
 0x12c   : > { %v485_v46 = vsel %vm484_vm1, %v479_v33, %v481_v44  ;;  %v486_v47 = vsel %vm484_vm1, %v481_v44, %v483_v16  ;;  %462 = vst [vmem:[#allocation4 + $0x20] sm:$0xf0] %v458_v45 }
 0x12d   : > { %489 = vst [vmem:[#allocation4 + $0x30] sm:$0xf] %v485_v46  ;;  %490 = vst [vmem:[#allocation4 + $0x38] sm:$0xf] %v486_v47  ;;  %v777_v47 = vpack.i.b16 %v776_v37, %v776_v37 }
 0x12e   : > { %v527_v48 = vpop.permute.xlu0 %526 }
 0x12f   : > { %v529_v49 = vpop.permute.xlu1 %528  ;;  %v531_v50 = vsel %vm530_vm2, %v525_v36, %v527_v48  ;;  %v539_v54 = vld [vmem:[#allocation4 + $0x10] sm:$0xff] }
 0x130   : > { %v532_v51 = vsel %vm530_vm2, %v527_v48, %v529_v49  ;;  %v540_v53 = vld [vmem:[#allocation4 + $0x18] sm:$0xff]  ;;  %535 = vst [vmem:[#allocation4 + $0x40] sm:$0xf] %v531_v50  ;;  %v547_v57 = vpack.c.bf16 %v539_v54, %v537_v56  ;;  %v784_v50 = vpack.i.b16 %v783_v41, %v783_v41  ;;  %v712_v54 = vpack.i.b16 %v265_v28, %v265_v28 }
 0x131   : > { %536 = vst [vmem:[#allocation4 + $0x48] sm:$0xf] %v532_v51  ;;  %v548_v55 = vpack.c.bf16 %v540_v53, %v538_v52  ;;  %v782_v53 = vrot.slane %v777_v47, %v1554_v4  ;;  %v719_v56 = vpack.i.b16 %v266_v31, %v266_v31 }
 0x133   : > { %597 = vmatprep.subr.bf16.mxu0 %v548_v55  ;;  %v541_v60 = vld [vmem:[#allocation4 + $0x20] sm:$0xff]  ;;  %v789_v55 = vrot.slane %v784_v50, %v1554_v4 }
 0x134   : > { %598 = vmatpush1.bf16.msra.mxu0 %v547_v57  ;;  %v544_v59 = vld [vmem:[#allocation4 + $0x38] sm:$0xff]  ;;  %v543_v61 = vld [vmem:[#allocation4 + $0x30] sm:$0xff]  ;;  %v717_v57 = vrot.slane %v712_v54, %v1554_v4 }
 0x135   : > { %v550_v62 = vpack.c.bf16 %v544_v59, %v542_v58  ;;  %v549_v63 = vpack.c.bf16 %v543_v61, %v541_v60  ;;  %v724_v58 = vrot.slane %v719_v56, %v1554_v4  ;;  %v703_v56 = vld [vmem:[%s1888_s5] sm:$0xff] }
 0x137   : > { %599 = vmatprep.subr.bf16.mxu0 %v550_v62  ;;  %v545_v1 = vld [vmem:[#allocation4 + $0x40] sm:$0xf] }
 0x138   : > { %600 = vmatpush1.bf16.msra.mxu0 %v549_v63  ;;  %v546_v0 = vld [vmem:[#allocation4 + $0x48] sm:$0xf]  ;;  %v551_v6 = vpack.c.bf16 %v545_v1, %v545_v1 }
 0x139   : > { %v552_v5 = vpack.c.bf16 %v546_v0, %v546_v0 }
 0x13a   : > { %v592_v8 = vsel %vm590_vm3, %v551_v6, 0 }
 0x13b   : > { %1402 = vmatprep.subr.msk.bf16.mxu0 %vm590_vm3, %v552_v5  ;;  %vm660_vm3 = vcmask 277640  }
 0x13c   : > { %602 = vmatpush1.bf16.msra.mxu0 %v592_v8  ;;  %661 = vst.msk [vmem:[#allocation3 + $0x10] sm:$0xff] %vm660_vm3, %v1497_v7  ;;  %662 = vst.msk [vmem:[#allocation3 + $0x28] sm:$0xff] %vm660_vm3, %v1497_v7 }
 0x13f   : > { %1403 = vmatmul.mubr.msk.bf16.vlgmr.msra.gmra.mrb[0].mxu0 %vm583_vm5, %v1464_v9  ;;  %v556_v16 = vpop.permute.xlu0 %555 }
 0x140   : > { %639 = vmatprep.mubr.bf16.mxu0 %v1497_v7  ;;  %v561_v20 = vpop.permute.xlu1 %560 }
 0x143   : > { %v571_v38 = vpop.permute.xlu0 %570 }
 0x144   : > { %v566_v33 = vpop.permute.xlu1 %565 }
 0x147   : > { %1404 = vmatmul.mubr.msk.bf16.gmra.mrb[4].mxu0 %vm583_vm5, %v1465_v10  ;;  %vm688_vm5 = vcmask 1047688  }
 0x148   : > { %1299 = vmatprep.mubr.bf16.mxu0 %v1497_v7 }
 0x212   : > { %v631_v17 = vpop.f32.mrb[0].mxu0 }
 0x213   : > { %v632_v18 = vadd.f32 %v631_v17, %v556_v16  ;;  %v633_v19 = vpop.f32.mrb[1].mxu0 }
 0x214   : > { %v634_v21 = vadd.f32 %v633_v19, %v556_v16  ;;  %v635_v22 = vpop.f32.mrb[2].mxu0 }
 0x215   : > { %v636_v24 = vadd.f32 %v635_v22, %v561_v20  ;;  %v637_v25 = vpop.f32.mrb[3].mxu0  ;;  %v650_v27 = vmax.f32 %v632_v18, 0.0 }
 0x216   : > { %v638_v26 = vadd.f32 %v637_v25, %v561_v20  ;;  %v651_v29 = vmax.f32 %v634_v21, 0.0 }
 0x217   : > { %v652_v2 = vmax.f32 %v636_v24, 0.0 }
 0x218   : > { %v653_v30 = vmax.f32 %v638_v26, 0.0 }
 0x219   : > { %v663_v32 = vpack.c.bf16 %v652_v2, %v650_v27 }
 0x21a   : > { %v664_v3 = vpack.c.bf16 %v653_v30, %v651_v29  ;;  %v641_v34 = vpop.f32.mrb[4].mxu0 }
 0x21b   : > { %v642_v35 = vadd.f32 %v641_v34, %v566_v33  ;;  %v643_v36 = vpop.f32.mrb[5].mxu0  ;;  %671 = vrot.lane.b32.xlu1 %v663_v32, %s1483_s29 }
 0x21c   : > { %v644_v39 = vadd.f32 %v643_v36, %v566_v33  ;;  %v645_v40 = vpop.f32.mrb[6].mxu0  ;;  %673 = vrot.lane.b32.xlu0 %v664_v3, %s1483_s29 }
 0x21d   : > { %v646_v42 = vadd.f32 %v645_v40, %v571_v38  ;;  %v647_v43 = vpop.f32.mrb[7].mxu0  ;;  %v654_v45 = vmax.f32 %v642_v35, 0.0 }
 0x21e   : > { %v648_v44 = vadd.f32 %v647_v43, %v571_v38  ;;  %v655_v48 = vmax.f32 %v644_v39, 0.0 }
 0x21f   : > { %v656_v46 = vmax.f32 %v646_v42, 0.0 }
 0x220   : > { %v657_v49 = vmax.f32 %v648_v44, 0.0 }
 0x221   : > { %v665_v51 = vpack.c.bf16 %v656_v46, %v654_v45 }
 0x222   : > { %v666_v52 = vpack.c.bf16 %v657_v49, %v655_v48 }
 0x223   : > { %675 = vrot.lane.b32.xlu1 %v665_v51, %s1483_s29 }
 0x224   : > { %677 = vrot.lane.b32.xlu0 %v666_v52, %s1483_s29  ;;  %v1468_v52 = vld [vmem:[%s1887_s4 + $0x4] ss:$12 sps:$4 sm:$0xff]  }
 0x225   : > { %1246 = vmatprep.mubr.bf16.mxu1 %v1468_v52 }
 0x227   : > { %792 = vrot.lane.b32.xlu1 %v782_v53, %s1485_s7 }
 0x228   : > { %794 = vrot.lane.b32.xlu0 %v789_v55, %s1485_s7 }
 0x22b   : > { %846 = vrot.lane.b32.xlu1 %v717_v57, %s1484_s30 }
 0x22c   : > { %848 = vrot.lane.b32.xlu0 %v724_v58, %s1484_s30  ;;  %s1870_s30 = scalar_lea.vmem %s1889_s6, %s1416_s23 }
 0x22f   : > { %935 = vrot.lane.b32.xlu1 %v782_v53, %s1487_s9 }
 0x230   : > { %937 = vrot.lane.b32.xlu0 %v789_v55, %s1487_s9 }
 0x233   : > { %987 = vrot.lane.b32.xlu1 %v717_v57, %s1486_s8 }
 0x234   : > { %989 = vrot.lane.b32.xlu0 %v724_v58, %s1486_s8 }
 0x237   : > { %1076 = vrot.lane.b32.xlu1 %v782_v53, %s1488_s10 }
 0x238   : > { %1078 = vrot.lane.b32.xlu0 %v789_v55, %s1488_s10 }
 0x28d   : > { %v672_v59 = vpop.permute.xlu1 %671 }
 0x28e   : > { %689 = vst.msk [vmem:[#allocation3] sm:$0xff] %vm688_vm5, %v672_v59  ;;  %v674_v4 = vpop.permute.xlu0 %673 }
 0x28f   : > { %v1691_v60 = vsel %vm277_vm4, %v672_v59, %v674_v4  ;;  %691 = vst.msk [vmem:[#allocation3 + $0x10] sm:$0xff] %vm277_vm4, %v674_v4  ;;  %v706_v59 = vld [vmem:[%s1888_s5 + $0x18] sm:$0xff] }
 0x290   : > { %v726_v61 = vmul.bf16 %v724_v58, %v1691_v60 }
 0x292   : > { %1214 = vmatprep.subr.bf16.mxu1 %v726_v61 }
 0x295   : > { %v676_v62 = vpop.permute.xlu1 %675  ;;  %v1695_v63 = vld [vmem:[#allocation3] sm:$0xff] }
 0x296   : > { %692 = vst.msk [vmem:[#allocation3 + $0x18] sm:$0xff] %vm688_vm5, %v676_v62  ;;  %745 = vrot.lane.b32.xlu1 %v1695_v63, %s1491_s13  ;;  %v678_v0 = vpop.permute.xlu0 %677  ;;  %v1699_v1 = vld [vmem:[#allocation3 + $0x10] sm:$0xff]  ;;  %v725_v5 = vmul.bf16 %v1695_v63, %v717_v57 }
 0x297   : > { %v1703_v6 = vsel %vm277_vm4, %v676_v62, %v678_v0  ;;  %694 = vst.msk [vmem:[#allocation3 + $0x28] sm:$0xff] %vm277_vm4, %v678_v0  ;;  %749 = vrot.lane.b32.xlu0 %v1699_v1, %s1491_s13 }
 0x298   : > { %1215 = vmatpush1.bf16.msra.mxu1 %v725_v5  ;;  %v728_v8 = vmul.bf16 %v724_v58, %v1703_v6  ;;  %v705_v58 = vld [vmem:[%s1888_s5 + $0x10] sm:$0xff] }
 0x299   : > { %v793_v10 = vpop.permute.xlu1 %792 }
 0x29a   : > { %904 = vrot.lane.b32.xlu1 %v1695_v63, %s1489_s11  ;;  %v795_v9 = vpop.permute.xlu0 %794  ;;  %1216 = vmatprep.subr.bf16.mxu1 %v728_v8  ;;  %v801_v15 = vmul.bf16 %v793_v10, %v1695_v63 }
 0x29b   : > { %908 = vrot.lane.b32.xlu0 %v1699_v1, %s1489_s11  ;;  %v803_v12 = vmul.bf16 %v795_v9, %v1699_v1  ;;  %v797_v23 = vsel %vm368_vm7, %v793_v10, %v795_v9 }
 0x29c   : > { %v802_v24 = vmul.bf16 %v797_v23, %v1691_v60  ;;  %v805_v35 = vmul.bf16 %v797_v23, %v1703_v6 }
 0x29d   : > { %v1713_v11 = vld [vmem:[#allocation3 + $0x18] sm:$0xff]  ;;  %v847_v16 = vpop.permute.xlu1 %846 }
 0x29e   : > { %747 = vrot.lane.b32.xlu1 %v1691_v60, %s1491_s13  ;;  %v849_v13 = vpop.permute.xlu0 %848  ;;  %v727_v14 = vmul.bf16 %v1713_v11, %v717_v57  ;;  %v855_v19 = vmul.bf16 %v847_v16, %v1695_v63  ;;  %v804_v27 = vmul.bf16 %v793_v10, %v1713_v11  ;;  %v858_v29 = vmul.bf16 %v847_v16, %v1713_v11  ;;  %v775_v30 = vld [vmem:[#allocation3 + $0x28] sm:$0xff]  ;;  %v704_v57 = vld [vmem:[%s1888_s5 + $0x8] sm:$0xff] }
 0x29f   : > { %817 = vrot.lane.b32.xlu0 %v803_v12, %s1493_s15  ;;  %v857_v17 = vmul.bf16 %v849_v13, %v1699_v1  ;;  %v851_v25 = vsel %vm395_vm6, %v847_v16, %v849_v13  ;;  %v806_v3 = vmul.bf16 %v795_v9, %v775_v30  ;;  %v860_v38 = vmul.bf16 %v849_v13, %v775_v30 }
 0x2a0   : > { %1217 = vmatpush1.bf16.msra.mxu1 %v727_v14  ;;  %v856_v26 = vmul.bf16 %v851_v25, %v1691_v60  ;;  %v859_v39 = vmul.bf16 %v851_v25, %v1703_v6 }
 0x2a1   : > { %v936_v21 = vpop.permute.xlu1 %935 }
 0x2a2   : > { %813 = vrot.lane.b32.xlu1 %v801_v15, %s1493_s15  ;;  %v938_v18 = vpop.permute.xlu0 %937  ;;  %v944_v22 = vmul.bf16 %v936_v21, %v1695_v63  ;;  %v947_v31 = vmul.bf16 %v936_v21, %v1713_v11 }
 0x2a3   : > { %871 = vrot.lane.b32.xlu0 %v857_v17, %s1494_s16  ;;  %v946_v20 = vmul.bf16 %v938_v18, %v1699_v1  ;;  %v940_v2 = vsel %vm441_vm8, %v936_v21, %v938_v18  ;;  %v949_v40 = vmul.bf16 %v938_v18, %v775_v30 }
 0x2a4   : > { %v945_v28 = vmul.bf16 %v940_v2, %v1691_v60  ;;  %v948_v48 = vmul.bf16 %v940_v2, %v1703_v6 }
 0x2a5   : > { %v988_v32 = vpop.permute.xlu1 %987 }
 0x2a6   : > { %867 = vrot.lane.b32.xlu1 %v855_v19, %s1494_s16  ;;  %v990_v33 = vpop.permute.xlu0 %989  ;;  %v999_v41 = vmul.bf16 %v988_v32, %v1713_v11  ;;  %v996_v44 = vmul.bf16 %v988_v32, %v1695_v63 }
 0x2a7   : > { %960 = vrot.lane.b32.xlu0 %v946_v20, %s1495_s17  ;;  %v992_v34 = vsel %vm469_vm9, %v988_v32, %v990_v33  ;;  %v998_v37 = vmul.bf16 %v990_v33, %v1699_v1  ;;  %v1001_v46 = vmul.bf16 %v990_v33, %v775_v30 }
 0x2a8   : > { %v997_v36 = vmul.bf16 %v992_v34, %v1691_v60  ;;  %v1000_v51 = vmul.bf16 %v992_v34, %v1703_v6 }
 0x2a9   : > { %v1077_v42 = vpop.permute.xlu1 %1076 }
 0x2aa   : > { %906 = vrot.lane.b32.xlu1 %v1691_v60, %s1489_s11  ;;  %v1079_v43 = vpop.permute.xlu0 %1078  ;;  %v1085_v49 = vmul.bf16 %v1077_v42, %v1695_v63  ;;  %v1088_v55 = vmul.bf16 %v1077_v42, %v1713_v11 }
 0x2ab   : > { %751 = vrot.lane.b32.xlu0 %v1713_v11, %s1491_s13  ;;  %v1081_v45 = vsel %vm515_vm10, %v1077_v42, %v1079_v43  ;;  %v1087_v50 = vmul.bf16 %v1079_v43, %v1699_v1  ;;  %v1090_v54 = vmul.bf16 %v1079_v43, %v775_v30 }
 0x2ac   : > { %v1086_v47 = vmul.bf16 %v1081_v45, %v1691_v60  ;;  %v1089_v53 = vmul.bf16 %v1081_v45, %v1703_v6 }
 0x2ae   : > { %956 = vrot.lane.b32.xlu1 %v944_v22, %s1495_s17 }
 0x2af   : > { %910 = vrot.lane.b32.xlu0 %v1713_v11, %s1489_s11 }
 0x2b2   : > { %815 = vrot.lane.b32.xlu1 %v802_v24, %s1493_s15 }
 0x2b3   : > { %753 = vrot.lane.b32.xlu0 %v1703_v6, %s1491_s13 }
 0x2b6   : > { %869 = vrot.lane.b32.xlu1 %v856_v26, %s1494_s16 }
 0x2b7   : > { %819 = vrot.lane.b32.xlu0 %v804_v27, %s1493_s15 }
 0x2ba   : > { %958 = vrot.lane.b32.xlu1 %v945_v28, %s1495_s17 }
 0x2bb   : > { %873 = vrot.lane.b32.xlu0 %v858_v29, %s1494_s16 }
 0x2be   : > { %755 = vrot.lane.b32.xlu1 %v775_v30, %s1491_s13 }
 0x2bf   : > { %912 = vrot.lane.b32.xlu0 %v1703_v6, %s1489_s11 }
 0x2c2   : > { %914 = vrot.lane.b32.xlu1 %v775_v30, %s1489_s11 }
 0x2c3   : > { %962 = vrot.lane.b32.xlu0 %v947_v31, %s1495_s17 }
 0x2c6   : > { %823 = vrot.lane.b32.xlu1 %v806_v3, %s1493_s15 }
 0x2c7   : > { %821 = vrot.lane.b32.xlu0 %v805_v35, %s1493_s15 }
 0x2ca   : > { %1010 = vrot.lane.b32.xlu1 %v997_v36, %s1492_s14 }
 0x2cb   : > { %1012 = vrot.lane.b32.xlu0 %v998_v37, %s1492_s14 }
 0x2ce   : > { %877 = vrot.lane.b32.xlu1 %v860_v38, %s1494_s16 }
 0x2cf   : > { %875 = vrot.lane.b32.xlu0 %v859_v39, %s1494_s16 }
 0x2d2   : > { %966 = vrot.lane.b32.xlu1 %v949_v40, %s1495_s17 }
 0x2d3   : > { %1014 = vrot.lane.b32.xlu0 %v999_v41, %s1492_s14 }
 0x2d6   : > { %1008 = vrot.lane.b32.xlu1 %v996_v44, %s1492_s14 }
 0x2d7   : > { %1049 = vrot.lane.b32.xlu0 %v1699_v1, %s1490_s12 }
 0x2da   : > { %1018 = vrot.lane.b32.xlu1 %v1001_v46, %s1492_s14 }
 0x2db   : > { %1099 = vrot.lane.b32.xlu0 %v1086_v47, %s1496_s18 }
 0x2de   : > { %1047 = vrot.lane.b32.xlu1 %v1691_v60, %s1490_s12 }
 0x2df   : > { %964 = vrot.lane.b32.xlu0 %v948_v48, %s1495_s17 }
 0x2e2   : > { %1045 = vrot.lane.b32.xlu1 %v1695_v63, %s1490_s12 }
 0x2e3   : > { %1097 = vrot.lane.b32.xlu0 %v1085_v49, %s1496_s18 }
 0x2e6   : > { %1101 = vrot.lane.b32.xlu1 %v1087_v50, %s1496_s18 }
 0x2e7   : > { %1016 = vrot.lane.b32.xlu0 %v1000_v51, %s1492_s14 }
 0x2ea   : > { %1053 = vrot.lane.b32.xlu1 %v1703_v6, %s1490_s12 }
 0x2eb   : > { %1055 = vrot.lane.b32.xlu0 %v775_v30, %s1490_s12 }
 0x2ee   : > { %1051 = vrot.lane.b32.xlu1 %v1713_v11, %s1490_s12 }
 0x2ef   : > { %1105 = vrot.lane.b32.xlu0 %v1089_v53, %s1496_s18 }
 0x2f2   : > { %1107 = vrot.lane.b32.xlu1 %v1090_v54, %s1496_s18 }
 0x2f3   : > { %1103 = vrot.lane.b32.xlu0 %v1088_v55, %s1496_s18 }
 0x2f6   : > { %1160 = vperm.xlu1 %1459, %v703_v56  }
 0x2f7   : > { %1165 = vperm.xlu0 %1458, %v704_v57  }
 0x2fa   : > { %1170 = vperm.xlu1 %1459, %v705_v58  }
 0x2fb   : > { %1175 = vperm.xlu0 %1458, %v706_v59  }
 0x308   : > { %v746_v4 = vpop.permute.xlu1 %745 }
 0x309   : > { %v750_v60 = vpop.permute.xlu0 %749 }
 0x30c   : > { %v905_v61 = vpop.permute.xlu1 %904 }
 0x30d   : > { %v909_v62 = vpop.permute.xlu0 %908 }
 0x310   : > { %v748_v63 = vpop.permute.xlu1 %747 }
 0x311   : > { %v818_v0 = vpop.permute.xlu0 %817  ;;  %v759_v1 = vsel %vm335_vm11, %v748_v63, %v750_v60  ;;  %v758_v5 = vsel %vm335_vm11, %v746_v4, %v748_v63 }
 0x312   : > { %1218 = vmatprep.subr.bf16.mxu1 %v759_v1 }
 0x313   : > { %1219 = vmatpush1.bf16.msra.mxu1 %v758_v5 }
 0x314   : > { %v814_v6 = vpop.permute.xlu1 %813 }
 0x315   : > { %v872_v8 = vpop.permute.xlu0 %871 }
 0x318   : > { %v868_v9 = vpop.permute.xlu1 %867 }
 0x319   : > { %v961_v10 = vpop.permute.xlu0 %960 }
 0x31c   : > { %v907_v11 = vpop.permute.xlu1 %906 }
 0x31d   : > { %v752_v12 = vpop.permute.xlu0 %751  ;;  %v918_v40 = vsel %vm429_vm13, %v907_v11, %v909_v62  ;;  %v917_v42 = vsel %vm429_vm13, %v905_v61, %v907_v11 }
 0x320   : > { %v957_v13 = vpop.permute.xlu1 %956 }
 0x321   : > { %v911_v14 = vpop.permute.xlu0 %910 }
 0x324   : > { %v816_v15 = vpop.permute.xlu1 %815 }
 0x325   : > { %v754_v16 = vpop.permute.xlu0 %753  ;;  %v827_v25 = vsel %vm383_vm15, %v816_v15, %v818_v0  ;;  %v826_v2 = vsel %vm383_vm15, %v814_v6, %v816_v15 }
 0x326   : > { %v760_v24 = vsel %vm335_vm11, %v752_v12, %v754_v16  ;;  %v1466_v12 = vld [vmem:[%s1887_s4] ss:$12 sps:$4 sm:$0xff]  }
 0x328   : > { %v870_v17 = vpop.permute.xlu1 %869 }
 0x329   : > { %v820_v18 = vpop.permute.xlu0 %819  ;;  %v881_v33 = vsel %vm411_vm0, %v870_v17, %v872_v8  ;;  %v880_v34 = vsel %vm411_vm0, %v868_v9, %v870_v17 }
 0x32c   : > { %v959_v19 = vpop.permute.xlu1 %958 }
 0x32d   : > { %v874_v20 = vpop.permute.xlu0 %873  ;;  %v970_v48 = vsel %vm457_vm14, %v959_v19, %v961_v10  ;;  %v969_v50 = vsel %vm457_vm14, %v957_v13, %v959_v19  ;;  %v1472_v19 = vld [vmem:[%s1887_s4 + $0x18] ss:$12 sps:$4 sm:$0xff]  }
 0x330   : > { %v756_v21 = vpop.permute.xlu1 %755 }
 0x331   : > { %v913_v22 = vpop.permute.xlu0 %912  ;;  %v761_v23 = vsel %vm335_vm11, %v754_v16, %v756_v21 }
 0x332   : > { %1220 = vmatprep.subr.bf16.mxu1 %v761_v23  ;;  %v919_v46 = vsel %vm429_vm13, %v911_v14, %v913_v22  ;;  %v1470_v14 = vld [vmem:[%s1887_s4 + $0x1c] ss:$12 sps:$4 sm:$0xff]  }
 0x333   : > { %1221 = vmatpush1.bf16.msra.mxu1 %v760_v24 }
 0x334   : > { %v915_v26 = vpop.permute.xlu1 %914  ;;  %1222 = vmatprep.subr.bf16.mxu1 %v827_v25 }
 0x335   : > { %v963_v27 = vpop.permute.xlu0 %962  ;;  %v920_v44 = vsel %vm429_vm13, %v913_v22, %v915_v26 }
 0x337   : > { %1223 = vmatpush1.bf16.msra.mxu1 %v826_v2 }
 0x338   : > { %v824_v28 = vpop.permute.xlu1 %823 }
 0x339   : > { %v822_v29 = vpop.permute.xlu0 %821 }
 0x33a   : > { %v829_v30 = vsel %vm383_vm15, %v822_v29, %v824_v28  ;;  %v828_v31 = vsel %vm383_vm15, %v820_v18, %v822_v29  ;;  %v1469_v18 = vld [vmem:[%s1887_s4 + $0x8] ss:$12 sps:$4 sm:$0xff]  }
 0x33b   : > { %1224 = vmatprep.subr.bf16.mxu1 %v829_v30 }
 0x33c   : > { %v1011_v32 = vpop.permute.xlu1 %1010  ;;  %1225 = vmatpush1.bf16.msra.mxu1 %v828_v31 }
 0x33d   : > { %1226 = vmatprep.subr.bf16.mxu1 %v881_v33  ;;  %v1013_v3 = vpop.permute.xlu0 %1012 }
 0x33e   : > { %v1022_v56 = vsel %vm484_vm1, %v1011_v32, %v1013_v3 }
 0x340   : > { %v878_v35 = vpop.permute.xlu1 %877  ;;  %1227 = vmatpush1.bf16.msra.mxu1 %v880_v34 }
 0x341   : > { %v876_v36 = vpop.permute.xlu0 %875 }
 0x342   : > { %v883_v37 = vsel %vm411_vm0, %v876_v36, %v878_v35  ;;  %v882_v38 = vsel %vm411_vm0, %v874_v20, %v876_v36  ;;  %v1473_v20 = vld [vmem:[%s1887_s4 + $0x20] ss:$12 sps:$4 sm:$0xff]  }
 0x343   : > { %1228 = vmatprep.subr.bf16.mxu1 %v883_v37 }
 0x344   : > { %v967_v39 = vpop.permute.xlu1 %966  ;;  %1229 = vmatpush1.bf16.msra.mxu1 %v882_v38 }
 0x345   : > { %1230 = vmatprep.subr.bf16.mxu1 %v918_v40  ;;  %v1015_v41 = vpop.permute.xlu0 %1014 }
 0x348   : > { %v1009_v43 = vpop.permute.xlu1 %1008  ;;  %1231 = vmatpush1.bf16.msra.mxu1 %v917_v42 }
 0x349   : > { %1232 = vmatprep.subr.bf16.mxu1 %v920_v44  ;;  %v1050_v45 = vpop.permute.xlu0 %1049  ;;  %v1021_v58 = vsel %vm484_vm1, %v1009_v43, %v1011_v32 }
 0x34c   : > { %v1019_v47 = vpop.permute.xlu1 %1018  ;;  %1233 = vmatpush1.bf16.msra.mxu1 %v919_v46 }
 0x34d   : > { %1234 = vmatprep.subr.bf16.mxu1 %v970_v48  ;;  %v1100_v49 = vpop.permute.xlu0 %1099 }
 0x350   : > { %v1048_v51 = vpop.permute.xlu1 %1047  ;;  %1235 = vmatpush1.bf16.msra.mxu1 %v969_v50 }
 0x351   : > { %v965_v52 = vpop.permute.xlu0 %964  ;;  %v1059_v1 = vsel %vm503_vm12, %v1048_v51, %v1050_v45 }
 0x352   : > { %v972_v53 = vsel %vm457_vm14, %v965_v52, %v967_v39  ;;  %v971_v54 = vsel %vm457_vm14, %v963_v27, %v965_v52 }
 0x353   : > { %1236 = vmatprep.subr.bf16.mxu1 %v972_v53 }
 0x354   : > { %v1046_v55 = vpop.permute.xlu1 %1045  ;;  %1237 = vmatpush1.bf16.msra.mxu1 %v971_v54 }
 0x355   : > { %1238 = vmatprep.subr.bf16.mxu1 %v1022_v56  ;;  %v1098_v57 = vpop.permute.xlu0 %1097  ;;  %v1058_v6 = vsel %vm503_vm12, %v1046_v55, %v1048_v51 }
 0x356   : > { %v1110_v61 = vsel %vm530_vm2, %v1098_v57, %v1100_v49 }
 0x358   : > { %v1102_v59 = vpop.permute.xlu1 %1101  ;;  %1239 = vmatpush1.bf16.msra.mxu1 %v1021_v58 }
 0x359   : > { %v1017_v4 = vpop.permute.xlu0 %1016  ;;  %v1111_v60 = vsel %vm530_vm2, %v1100_v49, %v1102_v59 }
 0x35a   : > { %1267 = vmatprep.subr.bf16.mxu0 %v1111_v60  ;;  %v1024_v62 = vsel %vm484_vm1, %v1017_v4, %v1019_v47  ;;  %v1023_v63 = vsel %vm484_vm1, %v1015_v41, %v1017_v4 }
 0x35b   : > { %1240 = vmatprep.subr.bf16.mxu1 %v1024_v62  ;;  %1268 = vmatpush1.bf16.msra.mxu0 %v1110_v61 }
 0x35c   : > { %v1054_v0 = vpop.permute.xlu1 %1053  ;;  %1241 = vmatpush1.bf16.msra.mxu1 %v1023_v63 }
 0x35d   : > { %1242 = vmatprep.subr.bf16.mxu1 %v1059_v1  ;;  %v1056_v5 = vpop.permute.xlu0 %1055 }
 0x35e   : > { %v1061_v9 = vsel %vm503_vm12, %v1054_v0, %v1056_v5 }
 0x360   : > { %v1052_v8 = vpop.permute.xlu1 %1051  ;;  %1243 = vmatpush1.bf16.msra.mxu1 %v1058_v6 }
 0x361   : > { %1244 = vmatprep.subr.bf16.mxu1 %v1061_v9  ;;  %v1106_v10 = vpop.permute.xlu0 %1105  ;;  %v1060_v11 = vsel %vm503_vm12, %v1052_v8, %v1054_v0 }
 0x364   : > { %v1108_v13 = vpop.permute.xlu1 %1107  ;;  %1245 = vmatpush1.bf16.msra.mxu1 %v1060_v11 }
 0x365   : > { %v1104_v15 = vpop.permute.xlu0 %1103  ;;  %v1113_v16 = vsel %vm530_vm2, %v1106_v10, %v1108_v13 }
 0x366   : > { %v1112_v17 = vsel %vm530_vm2, %v1104_v15, %v1106_v10  ;;  %1269 = vmatprep.subr.bf16.mxu0 %v1113_v16 }
 0x367   : > { %1247 = vmatmul.mubr.bf16.vlgmr.msra.gmra.mrb[0].mxu1 %v1466_v12  ;;  %1270 = vmatpush1.bf16.msra.mxu0 %v1112_v17 }
 0x368   : > { %1256 = vmatprep.mubr.bf16.mxu1 %v1470_v14 }
 0x36a   : > { %1411 = vmatmul.mubr.msk.bf16.vlgmr.msra.gmra.mrb[8].mxu0 %vm469_vm9, %v1469_v18 }
 0x36b   : > { %1309 = vmatprep.mubr.bf16.mxu0 %v1497_v7 }
 0x36f   : > { %1257 = vmatmul.mubr.bf16.gmra.mrb[4].mxu1 %v1472_v19 }
 0x372   : > { %1412 = vmatmul.mubr.msk.bf16.gmra.mrb[12].mxu0 %vm469_vm9, %v1473_v20 }
 0x375   : > { %v1161_v21 = vpop.permute.xlu1 %1160 }
 0x376   : > { %v1166_v25 = vpop.permute.xlu0 %1165 }
 0x379   : > { %v1171_v38 = vpop.permute.xlu1 %1170 }
 0x37a   : > { %v1176_v44 = vpop.permute.xlu0 %1175 }
 0x43a   : > { %v1248_v22 = vpop.f32.mrb[0].mxu1 }
 0x43b   : > { %v1249_v23 = vadd.f32 %v1248_v22, %v1161_v21  ;;  %v1250_v24 = vpop.f32.mrb[1].mxu1 }
 0x43c   : > { %v1251_v26 = vadd.f32 %v1250_v24, %v1161_v21  ;;  %v1252_v27 = vpop.f32.mrb[2].mxu1 }
 0x43d   : > { %v1253_v2 = vadd.f32 %v1252_v27, %v1166_v25  ;;  %v1254_v28 = vpop.f32.mrb[3].mxu1  ;;  %v1301_v29 = vpop.f32.mrb[8].mxu0 }
 0x43e   : > { %v1255_v30 = vadd.f32 %v1254_v28, %v1166_v25  ;;  %v1302_v7 = vadd.f32 %v1301_v29, %v1249_v23  ;;  %v1303_v31 = vpop.f32.mrb[9].mxu0 }
 0x43f   : > { %v1304_v32 = vadd.f32 %v1303_v31, %v1251_v26  ;;  %v1305_v33 = vpop.f32.mrb[10].mxu0 }
 0x440   : > { %v1320_v3 = vmax.f32 %v1302_v7, 0.0  ;;  %v1306_v34 = vadd.f32 %v1305_v33, %v1253_v2  ;;  %v1307_v35 = vpop.f32.mrb[11].mxu0 }
 0x441   : > { %v1321_v36 = vmax.f32 %v1304_v32, 0.0  ;;  %v1308_v37 = vadd.f32 %v1307_v35, %v1255_v30 }
 0x442   : > { %1328 = vst [vmem:[%s1870_s30] sm:$0xff] %v1320_v3  ;;  %v1322_v39 = vmax.f32 %v1306_v34, 0.0  ;;  %v1258_v40 = vpop.f32.mrb[4].mxu1 }
 0x443   : > { %1329 = vst [vmem:[%s1870_s30 + $0x8] sm:$0xff] %v1321_v36  ;;  %v1323_v41 = vmax.f32 %v1308_v37, 0.0  ;;  %v1259_v42 = vadd.f32 %v1258_v40, %v1171_v38  ;;  %v1260_v43 = vpop.f32.mrb[5].mxu1 }
 0x444   : > { %1330 = vst [vmem:[%s1870_s30 + $0x10] sm:$0xff] %v1322_v39  ;;  %v1261_v45 = vadd.f32 %v1260_v43, %v1171_v38  ;;  %v1262_v46 = vpop.f32.mrb[6].mxu1 }
 0x445   : > { %1331 = vst [vmem:[%s1870_s30 + $0x18] sm:$0xff] %v1323_v41  ;;  %v1263_v47 = vadd.f32 %v1262_v46, %v1176_v44  ;;  %v1264_v48 = vpop.f32.mrb[7].mxu1  ;;  %v1311_v49 = vpop.f32.mrb[12].mxu0 }
 0x446   : > { %v1265_v50 = vadd.f32 %v1264_v48, %v1176_v44  ;;  %v1312_v51 = vadd.f32 %v1311_v49, %v1259_v42  ;;  %v1313_v52 = vpop.f32.mrb[13].mxu0 }
 0x447   : > { %v1314_v53 = vadd.f32 %v1313_v52, %v1261_v45  ;;  %v1315_v54 = vpop.f32.mrb[14].mxu0 }
 0x448   : > { %v1324_v55 = vmax.f32 %v1312_v51, 0.0  ;;  %v1316_v56 = vadd.f32 %v1315_v54, %v1263_v47  ;;  %v1317_v57 = vpop.f32.mrb[15].mxu0 }
 0x449   : > { %v1325_v58 = vmax.f32 %v1314_v53, 0.0  ;;  %v1318_v59 = vadd.f32 %v1317_v57, %v1265_v50 }
 0x44a   : > { %1332 = vst [vmem:[%s1870_s30 + $0x20] sm:$0xff] %v1324_v55  ;;  %v1326_v4 = vmax.f32 %v1316_v56, 0.0 }
 0x44b   : > { %1333 = vst [vmem:[%s1870_s30 + $0x28] sm:$0xff] %v1325_v58  ;;  %v1327_v60 = vmax.f32 %v1318_v59, 0.0 }
 0x44c   : > { %1334 = vst [vmem:[%s1870_s30 + $0x30] sm:$0xff] %v1326_v4 }
 0x44d   : > { %1335 = vst [vmem:[%s1870_s30 + $0x38] sm:$0xff] %v1327_v60 }
 0x44e PF: > { %s16_s21 = sadd.s32 1, %s1480_s21  }
 0x44f   : > { %p13_p4 = scmp.ge.s32.totalorder %s16_s21, 4  }
 0x451   :  { %15 = sbr.rel (!%p13_p4) target bundleno = 1 (0x1), region = 74 }

</bundles_post_ra>
